<compile_context>
chip_gen: v5e
topology: v5e:2x2
jax: 0.10.0
libtpu: 0.0.40
codegen_flags: <defaults>
</compile_context>

<pallas_src>
import functools

import jax
import jax.numpy as jnp
import numpy as np
from jax.experimental import pallas as pl
from jax.experimental.pallas import tpu as pltpu


# ---------------------------------------------------------------------------
# Fused kernel: conv(k, s=1, 'same') + train-mode BatchNorm + ReLU
# grid = (2, N_blocks): phase 0 conv+stats, phase 1 BN+ReLU
# ---------------------------------------------------------------------------
def _conv_bn_relu_kernel(x_ref, m_ref, prm_ref, red_ref, bcast_ref, o_ref,
                         lhs, ybuf, stats, ss,
                         *, H, W, Cin, Cout, K, Nb, eps, count):
    p = pl.program_id(0)          # 0: conv + batch-stat accumulation, 1: BN + ReLU
    b = pl.program_id(1)          # image-block index
    pad = (K - 1) // 2
    WCin = W * Cin

    @pl.when(jnp.logical_and(p == 0, b == 0))
    def _init():
        # Zero once: the per-image H-halo rows of the fused LHS stay zero forever
        # (data rows are overwritten every step), plus the stat accumulators.
        lhs[...] = jnp.zeros_like(lhs)
        stats[...] = jnp.zeros_like(stats)

    @pl.when(p == 0)
    def _conv_and_stats():
        # Fused-LHS layout: lhs[i*H + r, kh*WCin + j] = x[img i, row r + kh - pad, j]
        # (zero at the per-image H boundary; W boundary zeros are folded into M).
        # Center tap is a single full-block copy; the shifted taps are per-image
        # copies so halos never leak across image boundaries inside the block.
        lhs[:, pad * WCin:(pad + 1) * WCin] = x_ref[...]
        for kh in range(K):
            sft = kh - pad
            if sft == 0:
                continue
            rows = H - abs(sft)
            for i in range(Nb):
                dst0 = i * H + max(0, -sft)
                src0 = i * H + max(0, sft)
                lhs[dst0:dst0 + rows, kh * WCin:(kh + 1) * WCin] = \
                    x_ref[src0:src0 + rows, :]

        # ONE MXU matmul, contraction depth K*W*Cin, f32 accumulation.
        # (Conv bias dropped: it cancels exactly under train-mode BatchNorm.)
        y = jnp.dot(lhs[...].astype(m_ref.dtype), m_ref[...],
                    preferred_element_type=jnp.float32)

        ybuf[b] = y                     # pre-BN activations stay VMEM-resident
        # Per-(w, co) lane-resident partial sums (full 128-lane rows, no relayout).
        stats[0:1, :] = stats[0:1, :] + jnp.sum(y, axis=0, keepdims=True)
        stats[1:2, :] = stats[1:2, :] + jnp.sum(y * y, axis=0, keepdims=True)

    @pl.when(jnp.logical_and(p == 1, b == 0))
    def _finalize_stats():
        # (2, W*Cout) per-(w,co) sums -> per-channel moments -> tiled back to lanes
        # with two tiny matmuls (no (W*Cout)^2 matrix, no strided lane reductions).
        tot_c = jnp.dot(stats[...], red_ref[...], preferred_element_type=jnp.float32)
        tiled = jnp.dot(tot_c, bcast_ref[...], preferred_element_type=jnp.float32)
        inv_n = 1.0 / count
        mean = tiled[0:1, :] * inv_n
        # Clamp the single-pass variance: E[y^2]-E[y]^2 can round slightly
        # negative and rsqrt(neg + eps) would NaN the whole output.
        var = jnp.maximum(tiled[1:2, :] * inv_n - mean * mean, 0.0)
        scale = prm_ref[0:1, :] * jax.lax.rsqrt(var + eps)     # gamma / sqrt(var+eps)
        ss[0:1, :] = scale
        ss[1:2, :] = prm_ref[1:2, :] - mean * scale            # beta - mean*scale

    @pl.when(p == 1)
    def _bn_relu():
        o_ref[...] = jnp.maximum(ybuf[b] * ss[0:1, :] + ss[1:2, :],
                                 0.0).astype(o_ref.dtype)


# ---------------------------------------------------------------------------
# Wrappers (layout + weight preprocessing glue)
# ---------------------------------------------------------------------------
def _pick_images_per_step(N, H, target_rows):
    """Largest divisor of N such that Nb*H <= target_rows (>=1)."""
    cap = max(1, target_rows // H)
    nb = 1
    for d in range(1, N + 1):
        if N % d == 0 and d <= cap:
            nb = d
    return nb


def conv2d_block_forward_nhwc(x_nhwc, weight, gamma, beta, *, eps=1e-5,
                              mxu_dtype=jnp.bfloat16, target_rows=256):
    """Lane-dense core. x_nhwc: (N, H, W, Cin); weight: (Cout, Cin, K, K)."""
    N, H, W, Cin = x_nhwc.shape
    Cout, Cin_w, K, K2 = weight.shape
    assert Cin_w == Cin and K == K2 and K % 2 == 1
    pad = (K - 1) // 2
    WCin, WCout = W * Cin, W * Cout

    Nb = _pick_images_per_step(N, H, target_rows)   # images per grid step (M rows)
    NB = N // Nb                                    # image blocks
    assert (Nb * H) % 8 == 0 or NB == 1

    # NHWC is already lane-dense: flattening to (N*H, W*Cin) is free.
    x_l = x_nhwc.reshape(N * H, WCin)

    # Stacked banded weight:
    #   M[kh*WCin + (w + kw - pad)*Cin + ci, w*Cout + co] = weight[co, ci, kh, kw]
    # (out-of-range w+kw-pad entries absent -> W-boundary zero padding).
    w_hwio = jnp.transpose(weight, (2, 3, 1, 0)).astype(jnp.float32)  # (K,K,Cin,Cout)
    bands = []
    for kh in range(K):
        band = jnp.zeros((WCin, WCout), jnp.float32)
        for kw in range(K):
            band = band + jnp.kron(jnp.eye(W, k=pad - kw, dtype=jnp.float32),
                                   w_hwio[kh, kw])
        bands.append(band)
    m_stacked = jnp.concatenate(bands, axis=0).astype(mxu_dtype)      # (K*WCin, WCout)

    # gamma / beta tiled to the lane-dense (w, co) layout (conv bias dropped).
    prm = jnp.stack([jnp.tile(gamma, W), jnp.tile(beta, W)]).astype(jnp.float32)
    # channel-reduce and channel-broadcast matrices (small; replaces (WCout)^2 csum).
    red = jnp.tile(jnp.eye(Cout, dtype=jnp.float32), (W, 1))          # (WCout, Cout)
    bcast = jnp.tile(jnp.eye(Cout, dtype=jnp.float32), (1, W))        # (Cout, WCout)

    # Explicit VMEM budget (double-buffered inputs/outputs + scratch) and limit.
    itm_x = x_l.dtype.itemsize
    itm_m = jnp.dtype(mxu_dtype).itemsize
    est = (2 * Nb * H * WCin * itm_x                       # x blocks
           + 2 * K * WCin * WCout * itm_m                  # stacked weights
           + 2 * (2 * WCout + WCout * Cout + Cout * WCout) * 4   # prm/red/bcast
           + 2 * Nb * H * WCout * 4                        # output blocks
           + Nb * H * K * WCin * itm_x                     # fused-LHS scratch
           + NB * Nb * H * WCout * 4                       # whole-batch pre-BN ybuf
           + 2 * 2 * WCout * 4)                            # stats + scale/shift
    vmem_limit = int(min(64 << 20, max(16 << 20, 2 * est)))
    assert est < vmem_limit, (est, vmem_limit)

    kernel = functools.partial(_conv_bn_relu_kernel, H=H, W=W, Cin=Cin, Cout=Cout,
                               K=K, Nb=Nb, eps=float(eps), count=float(N * H * W))

    out_l = pl.pallas_call(
        kernel,
        out_shape=jax.ShapeDtypeStruct((N * H, WCout), jnp.float32),
        grid_spec=pltpu.PrefetchScalarGridSpec(
            num_scalar_prefetch=0,
            grid=(2, NB),                                   # (phase, image block)
            in_specs=[
                # phase 0: block b; phase 1: pinned to the last-fetched block so the
                # (0, NB-1) -> (1, 0) transition issues no dead DMA.
                pl.BlockSpec((Nb * H, WCin),
                             lambda p, b: ((1 - p) * b + p * (NB - 1), 0)),
                pl.BlockSpec((K * WCin, WCout), lambda p, b: (0, 0)),   # resident
                pl.BlockSpec((2, WCout), lambda p, b: (0, 0)),          # resident
                pl.BlockSpec((WCout, Cout), lambda p, b: (0, 0)),       # resident
                pl.BlockSpec((Cout, WCout), lambda p, b: (0, 0)),       # resident
            ],
            # Only phase 1 writes the output; phase 0 maps onto block 0 so no stale
            # block is flushed before the phase transition.
            out_specs=pl.BlockSpec((Nb * H, WCout), lambda p, b: (p * b, 0)),
            scratch_shapes=[
                pltpu.VMEM((Nb * H, K * WCin), x_l.dtype),   # fused, H-halo'd LHS
                pltpu.VMEM((NB, Nb * H, WCout), jnp.float32),  # pre-BN activations
                pltpu.VMEM((2, WCout), jnp.float32),           # sum / sumsq
                pltpu.VMEM((2, WCout), jnp.float32),           # scale / shift
            ],
        ),
        compiler_params=pltpu.CompilerParams(
            # Phase axis must run sequentially; b carries the resident stats/ybuf.
            dimension_semantics=("arbitrary", "arbitrary"),
            vmem_limit_bytes=vmem_limit,
        ),
    )(x_l, m_stacked, prm, red, bcast)

    return out_l.reshape(N, H, W, Cout)


def conv2d_block_forward(x_nchw, weight, bias, gamma, beta, *, eps=1e-5,
                         mxu_dtype=jnp.bfloat16):
    """NCHW adapter matching the PyTorch module. Prefer the NHWC entry point to
    avoid the two layout transposes (they are pure extra HBM passes)."""
    # Conv bias followed by train-mode BatchNorm cancels exactly; accepted for
    # nn.Conv2d parity but intentionally unused.
    del bias
    x_nhwc = jnp.transpose(x_nchw, (0, 2, 3, 1))
    out_nhwc = conv2d_block_forward_nhwc(x_nhwc, weight, gamma, beta, eps=eps,
                                         mxu_dtype=mxu_dtype)
    return jnp.transpose(out_nhwc, (0, 3, 1, 2))


# ---------------------------------------------------------------------------
# Pure-JAX reference for validation
# ---------------------------------------------------------------------------
def _reference(x_nchw, weight, bias, gamma, beta, eps=1e-5):
    y = jax.lax.conv_general_dilated(
        x_nchw, weight, window_strides=(1, 1), padding="SAME",
        dimension_numbers=("NCHW", "OIHW", "NCHW"),
    ) + bias.reshape(1, -1, 1, 1)
    mean = jnp.mean(y, axis=(0, 2, 3), keepdims=True)
    var = jnp.mean((y - mean) ** 2, axis=(0, 2, 3), keepdims=True)
    yhat = (y - mean) * jax.lax.rsqrt(var + eps)
    return jnp.maximum(yhat * gamma.reshape(1, -1, 1, 1)
                       + beta.reshape(1, -1, 1, 1), 0.0)


if __name__ == "__main__":
    # Conv2DBlock(in_planes=4, out_planes=8, kernel_size=3)
    N, Cin, H, W = 2, 4, 16, 16
    Cout, K = 8, 3

    key = jax.random.PRNGKey(0)
    kx, kw, kb = jax.random.split(key, 3)

    x = jax.random.normal(kx, (N, Cin, H, W), dtype=jnp.float32)
    weight = 0.1 * jax.random.normal(kw, (Cout, Cin, K, K), dtype=jnp.float32)
    bias = 0.1 * jax.random.normal(kb, (Cout,), dtype=jnp.float32)
    gamma = jnp.ones((Cout,), jnp.float32)    # BatchNorm2d default init
    beta = jnp.zeros((Cout,), jnp.float32)

    ref = _reference(x, weight, bias, gamma, beta)

    # f32 MXU path (exact numerics).
    out_f32 = conv2d_block_forward(x, weight, bias, gamma, beta,
                                   mxu_dtype=jnp.float32)
    jax.block_until_ready(out_f32)
    np.testing.assert_allclose(np.asarray(out_f32), np.asarray(ref),
                               rtol=1e-4, atol=1e-4)

    # Default bf16 MXU path (f32 accumulation) — looser tolerance (bf16-rounded
    # conv outputs also feed the batch statistics).
    out_bf16 = conv2d_block_forward(x, weight, bias, gamma, beta)
    jax.block_until_ready(out_bf16)
    np.testing.assert_allclose(np.asarray(out_bf16), np.asarray(ref),
                               rtol=2e-2, atol=2e-2)

    print("KERNEL_OK")
</pallas_src>

<mosaic_0001>
module attributes {stable_mosaic.version = 11 : i64} {
  func.func @_conv_bn_relu_kernel(%arg0: i32, %arg1: i32, %arg2: memref<32x64xf32, #tpu.memory_space<vmem>>, %arg3: memref<192x128xf32, #tpu.memory_space<vmem>>, %arg4: memref<2x128xf32, #tpu.memory_space<vmem>>, %arg5: memref<128x8xf32, #tpu.memory_space<vmem>>, %arg6: memref<8x128xf32, #tpu.memory_space<vmem>>, %arg7: memref<32x128xf32, #tpu.memory_space<vmem>>, %arg8: memref<32x192xf32, #tpu.memory_space<vmem>>, %arg9: memref<1x32x128xf32, #tpu.memory_space<vmem>>, %arg10: memref<2x128xf32, #tpu.memory_space<vmem>>, %arg11: memref<2x128xf32, #tpu.memory_space<vmem>>) attributes {dimension_semantics = [#tpu.dimension_semantics<arbitrary>, #tpu.dimension_semantics<arbitrary>], iteration_bounds = array<i64: 2, 1>, scalar_prefetch = 0 : i64, scratch_operands = 4 : i64, tpu.core_type = #tpu.core_type<tc>, window_params = [{transform_indices = @transform_0, window_bounds = array<i64: 32, 64>}, {pipeline_mode = #tpu.pipeline_mode<synchronous>, transform_indices = @transform_1, window_bounds = array<i64: 192, 128>}, {pipeline_mode = #tpu.pipeline_mode<synchronous>, transform_indices = @transform_2, window_bounds = array<i64: 2, 128>}, {pipeline_mode = #tpu.pipeline_mode<synchronous>, transform_indices = @transform_3, window_bounds = array<i64: 128, 8>}, {pipeline_mode = #tpu.pipeline_mode<synchronous>, transform_indices = @transform_4, window_bounds = array<i64: 8, 128>}, {transform_indices = @transform_5, window_bounds = array<i64: 32, 128>}]} {
    %c0_i32 = arith.constant 0 : i32
    %0 = arith.cmpi eq, %arg0, %c0_i32 : i32
    %c0_i32_0 = arith.constant 0 : i32
    %1 = arith.cmpi eq, %arg1, %c0_i32_0 : i32
    %2 = arith.andi %0, %1 : i1
    %3 = arith.extui %2 : i1 to i32
    %c0_i32_1 = arith.constant 0 : i32
    %4 = arith.cmpi ne, %3, %c0_i32_1 : i32
    scf.if %4 {
      %cst = arith.constant 0.000000e+00 : f32
      %16 = vector.broadcast %cst : f32 to vector<32x192xf32>
      %c0 = arith.constant 0 : index
      %c0_8 = arith.constant 0 : index
      %17 = vector.load %arg8[%c0, %c0_8] : memref<32x192xf32, #tpu.memory_space<vmem>>, vector<32x192xf32>
      tpu.vector_store %arg8[%c0, %c0_8], %16 {strides = array<i32>} : memref<32x192xf32, #tpu.memory_space<vmem>>, vector<32x192xf32>,
      %cst_9 = arith.constant 0.000000e+00 : f32
      %18 = vector.broadcast %cst_9 : f32 to vector<2x128xf32>
      %c0_10 = arith.constant 0 : index
      %c0_11 = arith.constant 0 : index
      %19 = vector.load %arg10[%c0_10, %c0_11] : memref<2x128xf32, #tpu.memory_space<vmem>>, vector<2x128xf32>
      tpu.vector_store %arg10[%c0_10, %c0_11], %18 {strides = array<i32>} : memref<2x128xf32, #tpu.memory_space<vmem>>, vector<2x128xf32>,
    } else {
    }
    %c0_i32_2 = arith.constant 0 : i32
    %5 = arith.cmpi eq, %arg0, %c0_i32_2 : i32
    %6 = arith.extui %5 : i1 to i32
    %c0_i32_3 = arith.constant 0 : i32
    %7 = arith.cmpi ne, %6, %c0_i32_3 : i32
    scf.if %7 {
      %c0 = arith.constant 0 : index
      %c0_8 = arith.constant 0 : index
      %16 = vector.load %arg2[%c0, %c0_8] : memref<32x64xf32, #tpu.memory_space<vmem>>, vector<32x64xf32>
      %c0_9 = arith.constant 0 : index
      %c64 = arith.constant 64 : index
      %17 = vector.load %arg8[%c0_9, %c64] : memref<32x192xf32, #tpu.memory_space<vmem>>, vector<32x64xf32>
      tpu.vector_store %arg8[%c0_9, %c64], %16 {strides = array<i32>} : memref<32x192xf32, #tpu.memory_space<vmem>>, vector<32x64xf32>,
      %c0_10 = arith.constant 0 : index
      %c0_11 = arith.constant 0 : index
      %18 = vector.load %arg2[%c0_10, %c0_11] : memref<32x64xf32, #tpu.memory_space<vmem>>, vector<15x64xf32>
      %c1 = arith.constant 1 : index
      %c0_12 = arith.constant 0 : index
      %19 = vector.load %arg8[%c1, %c0_12] : memref<32x192xf32, #tpu.memory_space<vmem>>, vector<15x64xf32>
      tpu.vector_store %arg8[%c1, %c0_12], %18 {strides = array<i32>} : memref<32x192xf32, #tpu.memory_space<vmem>>, vector<15x64xf32>,
      %c16 = arith.constant 16 : index
      %c0_13 = arith.constant 0 : index
      %20 = vector.load %arg2[%c16, %c0_13] : memref<32x64xf32, #tpu.memory_space<vmem>>, vector<15x64xf32>
      %c17 = arith.constant 17 : index
      %c0_14 = arith.constant 0 : index
      %21 = vector.load %arg8[%c17, %c0_14] : memref<32x192xf32, #tpu.memory_space<vmem>>, vector<15x64xf32>
      tpu.vector_store %arg8[%c17, %c0_14], %20 {strides = array<i32>} : memref<32x192xf32, #tpu.memory_space<vmem>>, vector<15x64xf32>,
      %c1_15 = arith.constant 1 : index
      %c0_16 = arith.constant 0 : index
      %22 = vector.load %arg2[%c1_15, %c0_16] : memref<32x64xf32, #tpu.memory_space<vmem>>, vector<15x64xf32>
      %c0_17 = arith.constant 0 : index
      %c128 = arith.constant 128 : index
      %23 = vector.load %arg8[%c0_17, %c128] : memref<32x192xf32, #tpu.memory_space<vmem>>, vector<15x64xf32>
      tpu.vector_store %arg8[%c0_17, %c128], %22 {strides = array<i32>} : memref<32x192xf32, #tpu.memory_space<vmem>>, vector<15x64xf32>,
      %c17_18 = arith.constant 17 : index
      %c0_19 = arith.constant 0 : index
      %24 = vector.load %arg2[%c17_18, %c0_19] : memref<32x64xf32, #tpu.memory_space<vmem>>, vector<15x64xf32>
      %c16_20 = arith.constant 16 : index
      %c128_21 = arith.constant 128 : index
      %25 = vector.load %arg8[%c16_20, %c128_21] : memref<32x192xf32, #tpu.memory_space<vmem>>, vector<15x64xf32>
      tpu.vector_store %arg8[%c16_20, %c128_21], %24 {strides = array<i32>} : memref<32x192xf32, #tpu.memory_space<vmem>>, vector<15x64xf32>,
      %c0_22 = arith.constant 0 : index
      %c0_23 = arith.constant 0 : index
      %26 = vector.load %arg8[%c0_22, %c0_23] : memref<32x192xf32, #tpu.memory_space<vmem>>, vector<32x192xf32>
      %c0_24 = arith.constant 0 : index
      %c0_25 = arith.constant 0 : index
      %27 = vector.load %arg3[%c0_24, %c0_25] : memref<192x128xf32, #tpu.memory_space<vmem>>, vector<192x128xf32>
      %cst = arith.constant dense<0.000000e+00> : vector<32x128xf32>
      %28 = tpu.matmul %26, %27, %cst {dimension_numbers = #tpu.dot_dimension_numbers<[1], [0], [0], [1], [0, 0, 1, 1], [], []>} : vector<32x192xf32>, vector<192x128xf32>, vector<32x128xf32> -> vector<32x128xf32>
      %29 = arith.index_cast %arg1 : i32 to index
      %c0_26 = arith.constant 0 : index
      %c0_27 = arith.constant 0 : index
      %30 = vector.load %arg9[%29, %c0_26, %c0_27] : memref<1x32x128xf32, #tpu.memory_space<vmem>>, vector<1x32x128xf32>
      %31 = vector.shape_cast %30 : vector<1x32x128xf32> to vector<32x128xf32>
      %32 = vector.shape_cast %28 : vector<32x128xf32> to vector<1x32x128xf32>
      tpu.vector_store %arg9[%29, %c0_26, %c0_27], %32 {strides = array<i32>} : memref<1x32x128xf32, #tpu.memory_space<vmem>>, vector<1x32x128xf32>,
      %c0_28 = arith.constant 0 : index
      %c0_29 = arith.constant 0 : index
      %33 = vector.load %arg10[%c0_28, %c0_29] : memref<2x128xf32, #tpu.memory_space<vmem>>, vector<1x128xf32>
      %cst_30 = arith.constant dense<0.000000e+00> : vector<128xf32>
      %34 = vector.multi_reduction <add>, %28, %cst_30 [0] : vector<32x128xf32> to vector<128xf32>
      %35 = vector.shape_cast %34 : vector<128xf32> to vector<1x128xf32>
      %36 = arith.addf %33, %35 : vector<1x128xf32>
      %c0_31 = arith.constant 0 : index
      %c0_32 = arith.constant 0 : index
      %37 = vector.load %arg10[%c0_31, %c0_32] : memref<2x128xf32, #tpu.memory_space<vmem>>, vector<1x128xf32>
      tpu.vector_store %arg10[%c0_31, %c0_32], %36 {strides = array<i32>} : memref<2x128xf32, #tpu.memory_space<vmem>>, vector<1x128xf32>,
      %c1_33 = arith.constant 1 : index
      %c0_34 = arith.constant 0 : index
      %38 = vector.load %arg10[%c1_33, %c0_34] : memref<2x128xf32, #tpu.memory_space<vmem>>, vector<1x128xf32>
      %39 = arith.mulf %28, %28 : vector<32x128xf32>
      %cst_35 = arith.constant dense<0.000000e+00> : vector<128xf32>
      %40 = vector.multi_reduction <add>, %39, %cst_35 [0] : vector<32x128xf32> to vector<128xf32>
      %41 = vector.shape_cast %40 : vector<128xf32> to vector<1x128xf32>
      %42 = arith.addf %38, %41 : vector<1x128xf32>
      %c1_36 = arith.constant 1 : index
      %c0_37 = arith.constant 0 : index
      %43 = vector.load %arg10[%c1_36, %c0_37] : memref<2x128xf32, #tpu.memory_space<vmem>>, vector<1x128xf32>
      tpu.vector_store %arg10[%c1_36, %c0_37], %42 {strides = array<i32>} : memref<2x128xf32, #tpu.memory_space<vmem>>, vector<1x128xf32>,
    } else {
    }
    %c1_i32 = arith.constant 1 : i32
    %8 = arith.cmpi eq, %arg0, %c1_i32 : i32
    %c0_i32_4 = arith.constant 0 : i32
    %9 = arith.cmpi eq, %arg1, %c0_i32_4 : i32
    %10 = arith.andi %8, %9 : i1
    %11 = arith.extui %10 : i1 to i32
    %c0_i32_5 = arith.constant 0 : i32
    %12 = arith.cmpi ne, %11, %c0_i32_5 : i32
    scf.if %12 {
      %c0 = arith.constant 0 : index
      %c0_8 = arith.constant 0 : index
      %16 = vector.load %arg10[%c0, %c0_8] : memref<2x128xf32, #tpu.memory_space<vmem>>, vector<2x128xf32>
      %c0_9 = arith.constant 0 : index
      %c0_10 = arith.constant 0 : index
      %17 = vector.load %arg5[%c0_9, %c0_10] : memref<128x8xf32, #tpu.memory_space<vmem>>, vector<128x8xf32>
      %cst = arith.constant dense<0.000000e+00> : vector<2x8xf32>
      %18 = tpu.matmul %16, %17, %cst {dimension_numbers = #tpu.dot_dimension_numbers<[1], [0], [0], [1], [0, 0, 1, 1], [], []>} : vector<2x128xf32>, vector<128x8xf32>, vector<2x8xf32> -> vector<2x8xf32>
      %c0_11 = arith.constant 0 : index
      %c0_12 = arith.constant 0 : index
      %19 = vector.load %arg6[%c0_11, %c0_12] : memref<8x128xf32, #tpu.memory_space<vmem>>, vector<8x128xf32>
      %cst_13 = arith.constant dense<0.000000e+00> : vector<2x128xf32>
      %20 = tpu.matmul %18, %19, %cst_13 {dimension_numbers = #tpu.dot_dimension_numbers<[1], [0], [0], [1], [0, 0, 1, 1], [], []>} : vector<2x8xf32>, vector<8x128xf32>, vector<2x128xf32> -> vector<2x128xf32>
      %21 = vector.extract_strided_slice %20 {offsets = [0, 0], sizes = [1, 128], strides = [1, 1]} : vector<2x128xf32> to vector<1x128xf32>
      %cst_14 = arith.constant 0.001953125 : f32
      %22 = vector.broadcast %cst_14 : f32 to vector<1x128xf32>
      %23 = arith.mulf %21, %22 : vector<1x128xf32>
      %24 = vector.extract_strided_slice %20 {offsets = [1, 0], sizes = [1, 128], strides = [1, 1]} : vector<2x128xf32> to vector<1x128xf32>
      %cst_15 = arith.constant 0.001953125 : f32
      %25 = vector.broadcast %cst_15 : f32 to vector<1x128xf32>
      %26 = arith.mulf %24, %25 : vector<1x128xf32>
      %27 = arith.mulf %23, %23 : vector<1x128xf32>
      %28 = arith.subf %26, %27 : vector<1x128xf32>
      %cst_16 = arith.constant 0.000000e+00 : f32
      %29 = vector.broadcast %cst_16 : f32 to vector<1x128xf32>
      %30 = arith.maximumf %28, %29 : vector<1x128xf32>
      %c0_17 = arith.constant 0 : index
      %c0_18 = arith.constant 0 : index
      %31 = vector.load %arg4[%c0_17, %c0_18] : memref<2x128xf32, #tpu.memory_space<vmem>>, vector<1x128xf32>
      %cst_19 = arith.constant 9.99999974E-6 : f32
      %32 = vector.broadcast %cst_19 : f32 to vector<1x128xf32>
      %33 = arith.addf %30, %32 : vector<1x128xf32>
      %34 = math.rsqrt %33 : vector<1x128xf32>
      %35 = arith.mulf %31, %34 : vector<1x128xf32>
      %c0_20 = arith.constant 0 : index
      %c0_21 = arith.constant 0 : index
      %36 = vector.load %arg11[%c0_20, %c0_21] : memref<2x128xf32, #tpu.memory_space<vmem>>, vector<1x128xf32>
      tpu.vector_store %arg11[%c0_20, %c0_21], %35 {strides = array<i32>} : memref<2x128xf32, #tpu.memory_space<vmem>>, vector<1x128xf32>,
      %c1 = arith.constant 1 : index
      %c0_22 = arith.constant 0 : index
      %37 = vector.load %arg4[%c1, %c0_22] : memref<2x128xf32, #tpu.memory_space<vmem>>, vector<1x128xf32>
      %38 = arith.mulf %23, %35 : vector<1x128xf32>
      %39 = arith.subf %37, %38 : vector<1x128xf32>
      %c1_23 = arith.constant 1 : index
      %c0_24 = arith.constant 0 : index
      %40 = vector.load %arg11[%c1_23, %c0_24] : memref<2x128xf32, #tpu.memory_space<vmem>>, vector<1x128xf32>
      tpu.vector_store %arg11[%c1_23, %c0_24], %39 {strides = array<i32>} : memref<2x128xf32, #tpu.memory_space<vmem>>, vector<1x128xf32>,
    } else {
    }
    %c1_i32_6 = arith.constant 1 : i32
    %13 = arith.cmpi eq, %arg0, %c1_i32_6 : i32
    %14 = arith.extui %13 : i1 to i32
    %c0_i32_7 = arith.constant 0 : i32
    %15 = arith.cmpi ne, %14, %c0_i32_7 : i32
    scf.if %15 {
      %16 = arith.index_cast %arg1 : i32 to index
      %c0 = arith.constant 0 : index
      %c0_8 = arith.constant 0 : index
      %17 = vector.load %arg9[%16, %c0, %c0_8] : memref<1x32x128xf32, #tpu.memory_space<vmem>>, vector<1x32x128xf32>
      %18 = vector.shape_cast %17 : vector<1x32x128xf32> to vector<32x128xf32>
      %c0_9 = arith.constant 0 : index
      %c0_10 = arith.constant 0 : index
      %19 = vector.load %arg11[%c0_9, %c0_10] : memref<2x128xf32, #tpu.memory_space<vmem>>, vector<1x128xf32>
      %20 = vector.broadcast %19 : vector<1x128xf32> to vector<32x128xf32>
      %21 = arith.mulf %18, %20 : vector<32x128xf32>
      %c1 = arith.constant 1 : index
      %c0_11 = arith.constant 0 : index
      %22 = vector.load %arg11[%c1, %c0_11] : memref<2x128xf32, #tpu.memory_space<vmem>>, vector<1x128xf32>
      %23 = vector.broadcast %22 : vector<1x128xf32> to vector<32x128xf32>
      %24 = arith.addf %21, %23 : vector<32x128xf32>
      %cst = arith.constant 0.000000e+00 : f32
      %25 = vector.broadcast %cst : f32 to vector<32x128xf32>
      %26 = arith.maximumf %24, %25 : vector<32x128xf32>
      %c0_12 = arith.constant 0 : index
      %c0_13 = arith.constant 0 : index
      %27 = vector.load %arg7[%c0_12, %c0_13] : memref<32x128xf32, #tpu.memory_space<vmem>>, vector<32x128xf32>
      tpu.vector_store %arg7[%c0_12, %c0_13], %26 {strides = array<i32>} : memref<32x128xf32, #tpu.memory_space<vmem>>, vector<32x128xf32>,
    } else {
    }
    return
  }
  func.func @transform_0(%arg0: i32, %arg1: i32) -> (i32, i32) {
    %c1_i32 = arith.constant 1 : i32
    %0 = arith.subi %c1_i32, %arg0 : i32
    %1 = arith.muli %0, %arg1 : i32
    %c0_i32 = arith.constant 0 : i32
    %2 = arith.muli %arg0, %c0_i32 : i32
    %3 = arith.addi %1, %2 : i32
    %c0_i32_0 = arith.constant 0 : i32
    %c0_i32_1 = arith.constant 0 : i32
    return %3, %c0_i32_0 : i32, i32
  }
  func.func @transform_1(%arg0: i32, %arg1: i32) -> (i32, i32) {
    %c0_i32 = arith.constant 0 : i32
    %c0_i32_0 = arith.constant 0 : i32
    %c0_i32_1 = arith.constant 0 : i32
    return %c0_i32, %c0_i32_0 : i32, i32
  }
  func.func @transform_2(%arg0: i32, %arg1: i32) -> (i32, i32) {
    %c0_i32 = arith.constant 0 : i32
    %c0_i32_0 = arith.constant 0 : i32
    %c0_i32_1 = arith.constant 0 : i32
    return %c0_i32, %c0_i32_0 : i32, i32
  }
  func.func @transform_3(%arg0: i32, %arg1: i32) -> (i32, i32) {
    %c0_i32 = arith.constant 0 : i32
    %c0_i32_0 = arith.constant 0 : i32
    %c0_i32_1 = arith.constant 0 : i32
    return %c0_i32, %c0_i32_0 : i32, i32
  }
  func.func @transform_4(%arg0: i32, %arg1: i32) -> (i32, i32) {
    %c0_i32 = arith.constant 0 : i32
    %c0_i32_0 = arith.constant 0 : i32
    %c0_i32_1 = arith.constant 0 : i32
    return %c0_i32, %c0_i32_0 : i32, i32
  }
  func.func @transform_5(%arg0: i32, %arg1: i32) -> (i32, i32) {
    %0 = arith.muli %arg0, %arg1 : i32
    %c0_i32 = arith.constant 0 : i32
    %c0_i32_0 = arith.constant 0 : i32
    return %0, %c0_i32 : i32, i32
  }
}

</mosaic_0001>

<bundles_post_ra>
// kernel: tpu_custom_call.1
= control target key start
LH: loop header
LB: loop body
LE: loop exit
PB: predicated region body
PF: predicated region fallthrough
CT: control target
= control target key end

     0   :  { %10 = vsyncpa [#allocation7], 0  ;;  %s1124_s0 = inlined_call_operand.vmem [shape: f32[32,64], index: 0, kind: input, shape index: {}]   ;;  %s1125_s1 = inlined_call_operand.hbm [shape: f32[192,128], index: 1, kind: input, shape index: {}]   ;;  %s1126_s2 = inlined_call_operand.vmem [shape: f32[2,128], index: 2, kind: input, shape index: {}]   ;;  %s1127_s3 = inlined_call_operand.vmem [shape: f32[128,8], index: 3, kind: input, shape index: {}]   ;;  %s1128_s4 = inlined_call_operand.vmem [shape: f32[8,128], index: 4, kind: input, shape index: {}]   ;;  %s1129_s5 = inlined_call_operand.hbm [shape: f32[32,128], index: 5, kind: output, shape index: {}]  }
   0x1   :  { %11 = vsyncpa [#allocation8], 0 }
   0x2   :  { %13 = vsyncpa [#allocation8 + $0x1], 0  ;;  %s953_s18 = smov 0   ;;  %s955_s19 = smov 0  }
   0x3   :  { %s957_s20 = smov 0  }
   0x4 LB: > { %s713_s21 = sadd.s32 4294967295, %s913_s20   ;;  %s714_s22 = sadd.s32 4294967294, %s913_s20   ;;  %s913_s20 = sphi %s957_s20, %s19_s20   ;;  %s909_s19 = sphi %s955_s19, %s1132_s19   ;;  %s905_s18 = sphi %s953_s18, %s1131_s18  }
   0x5   : > { %s31_s23 = sadd.s32 1, %s909_s19  ;;  %p715_p0 = scmp.ge.s32.totalorder %s913_s20, 1 }
   0x6   : > { %p33_p1 = scmp.ge.s32.totalorder %s31_s23, 2  ;;  %p178_p2 = scmp.lt.s32.totalorder %s913_s20, 3 }
   0x7   : > { %p975_p3 = scmp.eq.s32.totalorder %s713_s21, 0  ;;  %s189_s27 = sshll.u32 %s1125_s1, 4  ;;  %s190_s27 = int_to_ptr.hbm [resolvable:$true] %s189_s27 }
   0x8   : > { %s1134_s23 = smov (%p33_p1, %s31_s23), 0  ;;  %p179_p4 = pnand %p715_p0, %p178_p2 }
   0x9   : > { %s915_s28 = smov [#allocation6]   ;;  %s916_s30 = smov 128  }
   0xa   : > { %p776_p5 = pneg %p179_p4  ;;  %s191_s29 = sshll.u32 %s915_s28, 4  ;;  %s192_s29 = int_to_ptr.vmem [resolvable:$true] %s191_s29 }
   0xb   : > { %s917_s6 = smov 8   ;;  %229 = sbr.rel (%p179_p4) target bundleno = 671 (0x29f), region = 40 }
   0xc   : > { %p777_p6 = pnand %p975_p3, %p776_p5 }
   0xe   : > { %779 = dma.hbm_to_vmem [thread:$0]  (!%p777_p6), %s190_s27, 3072, %s192_s29, [#allocation7], %s916_s30, %s916_s30, %s917_s6  }
  0x10   : > { %896 = dma.done.wait (%p975_p3), [#allocation7], 3072  }
  0x11   : > { %898 = vsyncadd (%p975_p3), [#allocation7], 4294964224  ;;  %p272_p7 = scmp.eq.s32.totalorder %s905_s18, 0 }
  0x12   : > { %v918_v0 = vmov (%p272_p7), 0.0   ;;  %vm279_vm0 = vcmask (%p272_p7), 523264  }
  0x13   : > { %277 = sbr.rel (!%p272_p7) target bundleno = 28 (0x1c), region = 48  ;;  %278 = vst [vmem:[#allocation2] sm:$0xff] (%p272_p7), %v918_v0 }
  0x14   : > { %281 = vst [vmem:[#allocation2 + $0x10] sm:$0xff] (%p272_p7), %v918_v0 }
  0x15   : > { %283 = vst [vmem:[#allocation2 + $0x20] sm:$0xff] (%p272_p7), %v918_v0 }
  0x16   : > { %285 = vst [vmem:[#allocation2 + $0x30] sm:$0xff] (%p272_p7), %v918_v0 }
  0x17   : > { %287 = vst [vmem:[#allocation4] sm:$0x3] (%p272_p7), %v918_v0 }
  0x18   : > { %280 = vst.msk [vmem:[#allocation2 + $0x8] sm:$0xff] %vm279_vm0, %v918_v0 }
  0x19   : > { %282 = vst.msk [vmem:[#allocation2 + $0x18] sm:$0xff] %vm279_vm0, %v918_v0 }
  0x1a   : > { %284 = vst.msk [vmem:[#allocation2 + $0x28] sm:$0xff] %vm279_vm0, %v918_v0 }
  0x1b   : > { %286 = vst.msk [vmem:[#allocation2 + $0x38] sm:$0xff] %vm279_vm0, %v918_v0 }
  0x1c PF: > { %p722_p8 = scmp.ne.s32.totalorder %s905_s18, 0 }
  0x1d   : > { %s919_s11 = smov (!%p722_p8), 64  }
  0x1e   : > { %290 = sbr.rel (%p722_p8) target bundleno = 325 (0x145), region = 52 }
  0x23   : > { %v294_v1 = vld [vmem:[%s1124_s0 + $0x18] sm:$0xff]  ;;  %v998_v2 = vld [vmem:[%s1124_s0 + $0x10] sm:$0xff]  ;;  %v370_v9 = vld [vmem:[#allocation6 + $0x60] sm:$0xff]  ;;  %vm328_vm1 = vcmask 523264   ;;  %vm344_vm2 = vcmask 522240   ;;  %vm320_vm3 = vcmask 1040384  }
  0x24   : > { %305 = vrot.lane.b32.xlu1 %v294_v1, %s919_s11  ;;  %303 = vrot.lane.b32.xlu0 %v998_v2, %s919_s11  ;;  %v373_v3 = vld [vmem:[#allocation6 + $0x78] sm:$0xff]  ;;  %v372_v4 = vld [vmem:[#allocation6 + $0x70] sm:$0xff]  ;;  %v371_v6 = vld [vmem:[#allocation6 + $0x68] sm:$0xff]  ;;  %v334_v39 = vrot.slane %v998_v2, 7  ;;  %vm311_vm4 = vcmask 1048064   ;;  %vm326_vm5 = vcmask 523265  }
  0x25   : > { %737 = vmatpush.msra.mxu3 %v373_v3  ;;  %v381_v5 = vld [vmem:[#allocation6 + $0xb8] sm:$0xff]  ;;  %394 = vmatpush.msra.mxu0 %v373_v3  ;;  %v380_v7 = vld [vmem:[#allocation6 + $0xb0] sm:$0xff]  ;;  %v379_v8 = vld [vmem:[#allocation6 + $0xa8] sm:$0xff] }
  0x26   : > { %431 = vmatpush.msra.mxu1 %v381_v5  ;;  %736 = vmatpush.msra.mxu2 %v373_v3  ;;  %v292_v10 = vld [vmem:[%s1124_s0 + $0x8] sm:$0xff]  ;;  %v1009_v11 = vld [vmem:[%s1124_s0] sm:$0xff]  ;;  %v346_v15 = vld [vmem:[%s1124_s0 + $0x11] sm:$0xff] }
  0x27   : > { %739 = vmatpush.msra.mxu3 %v372_v4  ;;  %395 = vmatpush.msra.mxu0 %v372_v4  ;;  %v369_v12 = vld [vmem:[#allocation6 + $0x58] sm:$0xff]  ;;  %v378_v13 = vld [vmem:[#allocation6 + $0xa0] sm:$0xff]  ;;  %v368_v16 = vld [vmem:[#allocation6 + $0x50] sm:$0xff]  ;;  %348 = vst.msk [vmem:[#allocation2 + $0x28] sm:$0xff] %vm328_vm1, %v346_v15  ;;  %v321_v44 = vrot.slane %v1009_v11, 7 }
  0x28   : > { %432 = vmatpush.msra.mxu1 %v380_v7  ;;  %738 = vmatpush.msra.mxu2 %v372_v4  ;;  %v341_v14 = vld [vmem:[%s1124_s0 + $0x1] sm:$0xff]  ;;  %v367_v18 = vld [vmem:[#allocation6 + $0x48] sm:$0xff]  ;;  %v376_v19 = vld [vmem:[#allocation6 + $0x90] sm:$0xff] }
  0x29   : > { %741 = vmatpush.msra.mxu3 %v371_v6  ;;  %396 = vmatpush.msra.mxu0 %v371_v6  ;;  %343 = vst.msk [vmem:[#allocation2 + $0x8] sm:$0xff] %vm328_vm1, %v341_v14  ;;  %v377_v17 = vld [vmem:[#allocation6 + $0x98] sm:$0xff]  ;;  %v366_v20 = vld [vmem:[#allocation6 + $0x40] sm:$0xff]  ;;  %v375_v21 = vld [vmem:[#allocation6 + $0x88] sm:$0xff] }
  0x2a   : > { %433 = vmatpush.msra.mxu1 %v379_v8  ;;  %740 = vmatpush.msra.mxu2 %v371_v6  ;;  %v365_v22 = vld [vmem:[#allocation6 + $0x38] sm:$0xff]  ;;  %v374_v23 = vld [vmem:[#allocation6 + $0x80] sm:$0xff]  ;;  %v364_v25 = vld [vmem:[#allocation6 + $0x30] sm:$0xff] }
  0x2b   : > { %743 = vmatpush.msra.mxu3 %v370_v9  ;;  %397 = vmatpush.msra.mxu0 %v370_v9  ;;  %v363_v26 = vld [vmem:[#allocation6 + $0x28] sm:$0xff]  ;;  %v362_v28 = vld [vmem:[#allocation6 + $0x20] sm:$0xff]  ;;  %v361_v29 = vld [vmem:[#allocation6 + $0x18] sm:$0xff] }
  0x2c   : > { %301 = vrot.lane.b32.xlu0 %v292_v10, %s919_s11  ;;  %299 = vrot.lane.b32.xlu1 %v1009_v11, %s919_s11  ;;  %v342_v27 = vld [vmem:[%s1124_s0 + $0x9] sm:$0x7f]  ;;  %v360_v30 = vld [vmem:[#allocation6 + $0x10] sm:$0xff] }
  0x2d   : > { %745 = vmatpush.msra.mxu3 %v369_v12  ;;  %434 = vmatpush.msra.mxu1 %v378_v13  ;;  %345 = vst.msk [vmem:[#allocation2 + $0x18] sm:$0x7f] %vm344_vm2, %v342_v27  ;;  %v359_v31 = vld [vmem:[#allocation6 + $0x8] sm:$0xff]  ;;  %v358_v33 = vld [vmem:[#allocation6] sm:$0xff]  ;;  %v347_v35 = vld [vmem:[%s1124_s0 + $0x19] sm:$0x7f] }
  0x2e   : > { %742 = vmatpush.msra.mxu2 %v370_v9  ;;  %398 = vmatpush.msra.mxu0 %v369_v12  ;;  %v355_v34 = vld [vmem:[#allocation2 + $0x28] sm:$0xff]  ;;  %349 = vst.msk [vmem:[#allocation2 + $0x38] sm:$0x7f] %vm344_vm2, %v347_v35  ;;  %v331_v36 = vld [vmem:[%s1124_s0 + $0x18] sm:$0x7f] }
  0x2f   : > { %747 = vmatpush.msra.mxu3 %v368_v16  ;;  %435 = vmatpush.msra.mxu1 %v377_v17  ;;  %v335_v37 = vrot.slane %v331_v36, 7  ;;  %v317_v43 = vld [vmem:[%s1124_s0 + $0x8] sm:$0x7f] }
  0x30   : > { %744 = vmatpush.msra.mxu2 %v369_v12  ;;  %399 = vmatpush.msra.mxu0 %v368_v16  ;;  %v351_v24 = vld [vmem:[#allocation2 + $0x8] sm:$0xff]  ;;  %v322_v45 = vrot.slane %v317_v43, 7 }
  0x31   : > { %749 = vmatpush.msra.mxu3 %v367_v18  ;;  %436 = vmatpush.msra.mxu1 %v376_v19  ;;  %v336_v40 = vsel %vm320_vm3, %v334_v39, %v335_v37 }
  0x32   : > { %746 = vmatpush.msra.mxu2 %v368_v16  ;;  %400 = vmatpush.msra.mxu0 %v367_v18  ;;  %v323_v46 = vsel %vm320_vm3, %v321_v44, %v322_v45 }
  0x33   : > { %751 = vmatpush.msra.mxu3 %v366_v20  ;;  %437 = vmatpush.msra.mxu1 %v375_v21 }
  0x34   : > { %748 = vmatpush.msra.mxu2 %v367_v18  ;;  %401 = vmatpush.msra.mxu0 %v366_v20  ;;  %v353_v32 = vld [vmem:[#allocation2 + $0x18] sm:$0xff] }
  0x35   : > { %753 = vmatpush.msra.mxu3 %v365_v22  ;;  %438 = vmatpush.msra.mxu1 %v374_v23  ;;  %v357_v38 = vld [vmem:[#allocation2 + $0x38] sm:$0xff]  ;;  %v470_v23 = vld [vmem:[#allocation4 + $0x1] sm:$0x1] }
  0x36   : > { %723 = vmatmul.msk.f32.vlgmr.msra.gmra.mxu1 %vm328_vm1, %v351_v24  ;;  %750 = vmatpush.msra.mxu2 %v366_v20  ;;  %v458_v20 = vld [vmem:[#allocation4] sm:$0x1] }
  0x37   : > { %755 = vmatpush.msra.mxu3 %v364_v25  ;;  %402 = vmatpush.msra.mxu0 %v365_v22 }
  0x38   : > { %752 = vmatpush.msra.mxu2 %v365_v22 }
  0x39   : > { %757 = vmatpush.msra.mxu3 %v363_v26  ;;  %403 = vmatpush.msra.mxu0 %v364_v25 }
  0x3a   : > { %754 = vmatpush.msra.mxu2 %v364_v25 }
  0x3b   : > { %404 = vmatpush.msra.mxu0 %v363_v26  ;;  %759 = vmatpush.msra.mxu3 %v362_v28 }
  0x3c   : > { %756 = vmatpush.msra.mxu2 %v363_v26 }
  0x3d   : > { %405 = vmatpush.msra.mxu0 %v362_v28  ;;  %761 = vmatpush.msra.mxu3 %v361_v29 }
  0x3e   : > { %758 = vmatpush.msra.mxu2 %v362_v28  ;;  %724 = vmatmul.msk.f32.gmra.mxu1 %vm328_vm1, %v353_v32 }
  0x3f   : > { %406 = vmatpush.msra.mxu0 %v361_v29  ;;  %763 = vmatpush.msra.mxu3 %v360_v30 }
  0x40   : > { %760 = vmatpush.msra.mxu2 %v361_v29 }
  0x41   : > { %407 = vmatpush.msra.mxu0 %v360_v30  ;;  %765 = vmatpush.msra.mxu3 %v359_v31 }
  0x42   : > { %762 = vmatpush.msra.mxu2 %v360_v30 }
  0x43   : > { %408 = vmatpush.msra.mxu0 %v359_v31  ;;  %767 = vmatpush.msra.mxu3 %v358_v33 }
  0x44   : > { %764 = vmatpush.msra.mxu2 %v359_v31 }
  0x45   : > { %409 = vmatpush.msra.mxu0 %v358_v33 }
  0x46   : > { %766 = vmatpush.msra.mxu2 %v358_v33  ;;  %725 = vmatmul.msk.f32.gmra.mxu1 %vm328_vm1, %v355_v34 }
  0x4e   : > { %726 = vmatmul.msk.f32.gmra.mxu1 %vm328_vm1, %v357_v38 }
  0x96   : > { %v306_v41 = vpop.permute.xlu1 %305  ;;  %v304_v42 = vpop.permute.xlu0 %303 }
  0x97   : > { %315 = vst.msk [vmem:[#allocation2 + $0x30] sm:$0xff] %vm311_vm4, %v306_v41 }
  0x98   : > { %340 = vst.msk [vmem:[#allocation2 + $0x30] sm:$0xff] %vm328_vm1, %v336_v40 }
  0x99   : > { %314 = vst.msk [vmem:[#allocation2 + $0x20] sm:$0xff] %vm311_vm4, %v304_v42 }
  0x9a   : > { %339 = vst.msk [vmem:[#allocation2 + $0x20] sm:$0xfe] %vm326_vm5, %v334_v39 }
  0x9e   : > { %v302_v47 = vpop.permute.xlu0 %301  ;;  %v300_v48 = vpop.permute.xlu1 %299 }
  0x9f   : > { %313 = vst.msk [vmem:[#allocation2 + $0x10] sm:$0xff] %vm311_vm4, %v302_v47  ;;  %v356_v51 = vld [vmem:[#allocation2 + $0x30] sm:$0xff] }
  0xa0   : > { %329 = vst.msk [vmem:[#allocation2 + $0x10] sm:$0xff] %vm328_vm1, %v323_v46 }
  0xa1   : > { %312 = vst.msk [vmem:[#allocation2] sm:$0xff] %vm311_vm4, %v300_v48  ;;  %v354_v49 = vld [vmem:[#allocation2 + $0x20] sm:$0xff] }
  0xa2   : > { %327 = vst.msk [vmem:[#allocation2] sm:$0xfe] %vm326_vm5, %v321_v44  ;;  %416 = vmatmul.f32.vlgmr.msra.gmra.mxu3 %v354_v49 }
  0xa7   : > { %v352_v50 = vld [vmem:[#allocation2 + $0x10] sm:$0xff] }
  0xa8   : > { %413 = vmatmul.f32.vlgmr.msra.gmra.mxu2 %v352_v50 }
  0xa9   : > { %v350_v52 = vld [vmem:[#allocation2] sm:$0xff] }
  0xaa   : > { %410 = vmatmul.f32.vlgmr.msra.gmra.mxu0 %v350_v52  ;;  %419 = vmatmul.f32.gmra.mxu3 %v356_v51 }
  0xb3   : > { %v440_v53 = vpop.f32.mrf.mxu1 }
  0xbb   : > { %v443_v54 = vpop.f32.mrf.mxu1 }
  0xc3   : > { %v446_v55 = vpop.f32.mrf.mxu1 }
  0xcb   : > { %v449_v61 = vpop.f32.mrf.mxu1 }
 0x125   : > { %v417_v56 = vpop.f32.mrf.mxu3 }
 0x126   : > { %v447_v57 = vadd.f32 %v446_v55, %v417_v56 }
 0x127   : > { %v411_v58 = vpop.f32.mrf.mxu0 }
 0x128   : > { %456 = vst [vmem:[#allocation3 + $0x18] sm:$0xff] %v447_v57  ;;  %v441_v59 = vadd.f32 %v440_v53, %v411_v58  ;;  %v473_v4 = vmul.f32 %v447_v57, %v447_v57 }
 0x12a   : > { %454 = vst [vmem:[#allocation3 + $0x10] sm:$0xff] %v441_v59  ;;  %v471_v0 = vmul.f32 %v441_v59, %v441_v59 }
 0x12b   : > { %v414_v60 = vpop.f32.mrf.mxu2 }
 0x12c   : > { %v444_v62 = vadd.f32 %v443_v54, %v414_v60 }
 0x12d   : > { %v420_v63 = vpop.f32.mrf.mxu3 }
 0x12e   : > { %455 = vst [vmem:[#allocation3] sm:$0xff] %v444_v62  ;;  %v459_v1 = vadd.f32 %v444_v62, %v441_v59  ;;  %v472_v2 = vmul.f32 %v444_v62, %v444_v62  ;;  %v450_v3 = vadd.f32 %v449_v61, %v420_v63 }
 0x130   : > { %v475_v5 = vadd.f32 %v472_v2, %v471_v0  ;;  %457 = vst [vmem:[#allocation3 + $0x8] sm:$0xff] %v450_v3  ;;  %v460_v6 = vadd.f32 %v459_v1, %v447_v57  ;;  %v474_v7 = vmul.f32 %v450_v3, %v450_v3 }
 0x132   : > { %v461_v8 = vadd.f32 %v460_v6, %v450_v3  ;;  %v476_v9 = vadd.f32 %v475_v5, %v473_v4 }
 0x134   : > { %v462_v10 = vrot.slane %v461_v8, 4  ;;  %v477_v11 = vadd.f32 %v476_v9, %v474_v7 }
 0x136   : > { %v463_v12 = vadd.f32 %v462_v10, %v461_v8  ;;  %v478_v13 = vrot.slane %v477_v11, 4 }
 0x138   : > { %v464_v14 = vrot.slane %v463_v12, 2  ;;  %v479_v15 = vadd.f32 %v478_v13, %v477_v11 }
 0x13a   : > { %v465_v16 = vadd.f32 %v464_v14, %v463_v12  ;;  %v480_v17 = vrot.slane %v479_v15, 2 }
 0x13c   : > { %v466_v18 = vrot.slane %v465_v16, 1  ;;  %v481_v19 = vadd.f32 %v480_v17, %v479_v15 }
 0x13e   : > { %v467_v21 = vadd.f32 %v466_v18, %v465_v16  ;;  %v482_v22 = vrot.slane %v481_v19, 1 }
 0x140   : > { %v468_v24 = vadd.f32 %v467_v21, %v458_v20  ;;  %v483_v25 = vadd.f32 %v482_v22, %v481_v19 }
 0x142   : > { %469 = vst [vmem:[#allocation4] sm:$0x1] %v468_v24  ;;  %v484_v26 = vadd.f32 %v483_v25, %v470_v23 }
 0x144   : > { %485 = vst [vmem:[#allocation4 + $0x1] sm:$0x1] %v484_v26 }
 0x145 PF: > { %p486_p9 = scmp.eq.s32.totalorder %s905_s18, 1 }
 0x146   : > { %v507_v27 = vld [vmem:[%s1127_s3 + $0x78] sm:$0xff] (%p486_p9)  ;;  %v506_v28 = vld [vmem:[%s1127_s3 + $0x70] sm:$0xff] (%p486_p9)  ;;  %v505_v29 = vld [vmem:[%s1127_s3 + $0x68] sm:$0xff] (%p486_p9)  ;;  %vm529_vm6 = vcmask (%p486_p9), 64512  }
 0x147   : > { %490 = sbr.rel (!%p486_p9) target bundleno = 649 (0x289), region = 56  ;;  %508 = vmatpush.msra.mxu0 (%p486_p9), %v507_v27  ;;  %v504_v30 = vld [vmem:[%s1127_s3 + $0x60] sm:$0xff] (%p486_p9)  ;;  %v503_v31 = vld [vmem:[%s1127_s3 + $0x58] sm:$0xff] (%p486_p9)  ;;  %v502_v32 = vld [vmem:[%s1127_s3 + $0x50] sm:$0xff] (%p486_p9) }
 0x148   : > { %v501_v33 = vld [vmem:[%s1127_s3 + $0x48] sm:$0xff] (%p486_p9)  ;;  %v500_v34 = vld [vmem:[%s1127_s3 + $0x40] sm:$0xff] (%p486_p9)  ;;  %v499_v35 = vld [vmem:[%s1127_s3 + $0x38] sm:$0xff] (%p486_p9) }
 0x149   : > { %509 = vmatpush.msra.mxu0 (%p486_p9), %v506_v28  ;;  %v498_v36 = vld [vmem:[%s1127_s3 + $0x30] sm:$0xff] (%p486_p9)  ;;  %v497_v37 = vld [vmem:[%s1127_s3 + $0x28] sm:$0xff] (%p486_p9)  ;;  %v496_v38 = vld [vmem:[%s1127_s3 + $0x20] sm:$0xff] (%p486_p9) }
 0x14a   : > { %v495_v39 = vld [vmem:[%s1127_s3 + $0x18] sm:$0xff] (%p486_p9)  ;;  %v494_v40 = vld [vmem:[%s1127_s3 + $0x10] sm:$0xff] (%p486_p9)  ;;  %v493_v41 = vld [vmem:[%s1127_s3 + $0x8] sm:$0xff] (%p486_p9) }
 0x14b   : > { %510 = vmatpush.msra.mxu0 (%p486_p9), %v505_v29  ;;  %v492_v42 = vld [vmem:[%s1127_s3] sm:$0xff] (%p486_p9) }
 0x14c   : > { %v491_v43 = vld [vmem:[#allocation4] sm:$0x3] }
 0x14d   : > { %511 = vmatpush.msra.mxu0 %v504_v30  ;;  %v528_v44 = vld [vmem:[%s1128_s4] sm:$0xff] }
 0x14e   : > { %548 = vmatpush.msra.mxu1 %v528_v44  ;;  %v560_v59 = vld [vmem:[%s1126_s2] sm:$0x1]  ;;  %v577_v63 = vld [vmem:[%s1126_s2 + $0x1] sm:$0x1] }
 0x14f   : > { %512 = vmatpush.msra.mxu0 %v503_v31 }
 0x151   : > { %513 = vmatpush.msra.mxu0 %v502_v32 }
 0x153   : > { %514 = vmatpush.msra.mxu0 %v501_v33 }
 0x155   : > { %515 = vmatpush.msra.mxu0 %v500_v34 }
 0x157   : > { %516 = vmatpush.msra.mxu0 %v499_v35 }
 0x159   : > { %517 = vmatpush.msra.mxu0 %v498_v36 }
 0x15b   : > { %518 = vmatpush.msra.mxu0 %v497_v37 }
 0x15d   : > { %519 = vmatpush.msra.mxu0 %v496_v38 }
 0x15f   : > { %520 = vmatpush.msra.mxu0 %v495_v39 }
 0x161   : > { %521 = vmatpush.msra.mxu0 %v494_v40 }
 0x163   : > { %522 = vmatpush.msra.mxu0 %v493_v41 }
 0x165   : > { %523 = vmatpush.msra.mxu0 %v492_v42 }
 0x166   : > { %524 = vmatmul.f32.vlgmr.msra.gmra.mxu0 %v491_v43 }
 0x1e3   : > { %v525_v45 = vpop.f32.mrf.mxu0 }
 0x1e4   : > { %728 = vmatmul.msk.f32.vlgmr.msra.gmra.mxu1 %vm529_vm6, %v525_v45 }
 0x261   : > { %v550_v46 = vpop.f32.mrf.mxu1 }
 0x262   : > { %v553_v47 = vmul.f32 0.001953125, %v550_v46 }
 0x264   : > { %v554_v48 = vmul.f32 %v553_v47, %v553_v47 }
 0x266   : > { %v556_v49 = vrot.slane %v554_v48, 7 }
 0x268   : > { %v558_v50 = vsub.f32 %v553_v47, %v556_v49 }
 0x26a   : > { %v559_v51 = vmax.f32 %v558_v50, 0.0 }
 0x26c   : > { %v561_v52 = vadd.f32 1e-05, %v559_v51 }
 0x26e   : > { %821 = vrsqrt.f32 %v561_v52  ;;  %vm568_vm8 = vweird.f32 %v561_v52 }
 0x274   : > { %v822_v53 = vpop.eup %821 }
 0x275   : > { %v563_v54 = vmul.f32 %v822_v53, %v561_v52  ;;  %vm569_vm7 = vweird.f32 %v822_v53 }
 0x276   : > { %vm570_vm9 = vmor %vm568_vm8, %vm569_vm7 }
 0x277   : > { %v564_v55 = vmul.f32 %v822_v53, %v563_v54 }
 0x279   : > { %v565_v56 = vmul.f32 0.5, %v564_v55 }
 0x27b   : > { %v566_v57 = vsub.f32 1.5, %v565_v56 }
 0x27d   : > { %v567_v58 = vmul.f32 %v822_v53, %v566_v57 }
 0x27f   : > { %v571_v60 = vsel %vm570_vm9, %v822_v53, %v567_v58 }
 0x280   : > { %v573_v61 = vrot.slane %v571_v60, 1 }
 0x282   : > { %v575_v62 = vmul.f32 %v573_v61, %v560_v59 }
 0x284   : > { %576 = vst [vmem:[#allocation5] sm:$0x1] %v575_v62  ;;  %v578_v0 = vmul.f32 %v575_v62, %v553_v47 }
 0x286   : > { %v579_v1 = vsub.f32 %v577_v63, %v578_v0 }
 0x288   : > { %580 = vst [vmem:[#allocation5 + $0x1] sm:$0x1] %v579_v1 }
 0x289 PF: > { %p729_p10 = scmp.ne.s32.totalorder %s905_s18, 1 }
 0x28b   : > { %583 = sbr.rel (%p729_p10) target bundleno = 667 (0x29b), region = 60 }
 0x290   : > { %v586_v2 = vld [vmem:[#allocation3 + $0x10] sm:$0xff]  ;;  %v823_v3 = vld [vmem:[#allocation5] ss:$0 sm:$0xff]  ;;  %v824_v4 = vld [vmem:[#allocation5 + $0x1] ss:$0 sm:$0xff] }
 0x291   : > { %v587_v5 = vld [vmem:[#allocation3] sm:$0xff]  ;;  %v592_v6 = vmul.f32 %v823_v3, %v586_v2  ;;  %v588_v8 = vld [vmem:[#allocation3 + $0x18] sm:$0xff]  ;;  %v589_v9 = vld [vmem:[#allocation3 + $0x8] sm:$0xff] }
 0x292   : > { %v593_v7 = vmul.f32 %v823_v3, %v587_v5  ;;  %v594_v10 = vmul.f32 %v823_v3, %v588_v8  ;;  %v595_v11 = vmul.f32 %v823_v3, %v589_v9 }
 0x293   : > { %v598_v12 = vadd.f32 %v824_v4, %v592_v6 }
 0x294   : > { %v599_v13 = vadd.f32 %v824_v4, %v593_v7  ;;  %v600_v14 = vadd.f32 %v824_v4, %v594_v10  ;;  %v601_v15 = vadd.f32 %v824_v4, %v595_v11 }
 0x295   : > { %v602_v16 = vmax.f32 %v598_v12, 0.0 }
 0x296   : > { %v603_v17 = vmax.f32 %v599_v13, 0.0  ;;  %v604_v18 = vmax.f32 %v600_v14, 0.0  ;;  %v605_v19 = vmax.f32 %v601_v15, 0.0 }
 0x297   : > { %606 = vst [vmem:[#allocation9] sm:$0xff] %v602_v16 }
 0x298   : > { %607 = vst [vmem:[#allocation9 + $0x8] sm:$0xff] %v603_v17 }
 0x299   : > { %608 = vst [vmem:[#allocation9 + $0x10] sm:$0xff] %v604_v18 }
 0x29a   : > { %609 = vst [vmem:[#allocation9 + $0x18] sm:$0xff] %v605_v19 }
 0x29b PF: > { %p786_p11 = scmp.eq.s32.totalorder %s713_s21, 1  ;;  %s626_s10 = sshll.u32 %s1129_s5, 4  ;;  %s627_s10 = int_to_ptr.hbm [resolvable:$true] %s626_s10 }
 0x29c   : > { %s920_s11 = smov [#allocation9]   ;;  %s921_s13 = smov 128  }
 0x29d   : > { %s624_s12 = sshll.u32 %s920_s11, 4  ;;  %s922_s14 = smov 8   ;;  %s625_s12 = int_to_ptr.vmem [resolvable:$true] %s624_s12 }
 0x29e   : > { %773 = dma.vmem_to_hbm [thread:$0]  (%p786_p11), %s625_s12, 512, %s627_s10, [#allocation8], %s921_s13, %s921_s13, %s922_s14  }
 0x29f PF: > { %p787_p12 = scmp.ge.s32.totalorder %s913_s20, 2  ;;  %p788_p13 = scmp.eq.s32.totalorder %s714_s22, 1 }
 0x2a1   : > { %p781_p0 = pnand %p788_p13, %p787_p12 }
 0x2a3   : > { %p782_p1 = pneg %p781_p0 }
 0x2a5   : > { %900 = dma.done.wait (%p782_p1), [#allocation8], 512  }
 0x2a6   : > { %902 = vsyncadd (%p782_p1), [#allocation8], 4294966784  ;;  %s19_s20 = sadd.s32 1, %s913_s20   ;;  %s1131_s18 = smov %s909_s19 }
 0x2a7   : > { %p16_p2 = scmp.ge.s32.totalorder %s19_s20, 4   ;;  %s1132_s19 = smov %s1134_s23 }
 0x2a9   :  { %18 = sbr.rel (!%p16_p2) target bundleno = 4 (0x4), region = 98 }
 0x2ae   :  { %648 = vsyncpa [#allocation7], 1 }
 0x2af   :  { %650 = vsyncpa [#allocation7 + $0x1], 1 }
 0x2b0   :  { %651 = vsyncpa [#allocation8], 1 }
 0x2b1   :  { %653 = vsyncpa [#allocation8 + $0x1], 1 }

</bundles_post_ra>
